<compile_context>
chip_gen: v6e
topology: v6e:2x2x1
jax: 0.10.0
libtpu: 0.0.40
codegen_flags: <defaults>
</compile_context>

<pallas_src>
import jax
import jax.numpy as jnp
from jax.experimental import pallas as pl
from jax.experimental.pallas import tpu as pltpu

_LANE = 128
_SUBLANE = 8


def _round_up(x, m):
    return ((x + m - 1) // m) * m


def _two_layer_kernel(x_ref, w1_ref, b1_ref, w2_ref, b2_ref, o_ref):
    # Layer 1 on the MXU, computed transposed so the hidden activations and the
    # output are lane-dense: W1 (16, D) contracted with x (tb, D) over D -> (16, tb).
    hT = jax.lax.dot_general(
        w1_ref[...], x_ref[...],
        dimension_numbers=(((1,), (1,)), ((), ())),
        preferred_element_type=jnp.float32,
    )
    # Bias (16,1) broadcasts over lanes; ReLU on the VPU with full 128-lane occupancy.
    hT = jnp.maximum(hT + b1_ref[...], 0.0)
    # Layer 2 (16 -> 1): VPU multiply by the (16,1) weight column, XLU sublane
    # reduction -> (1, tb) lane-dense row, scalar bias from SMEM.
    z = jnp.sum(hT * w2_ref[...], axis=0, keepdims=True) + b2_ref[0, 0]
    o_ref[...] = z.astype(o_ref.dtype)


def _padded_x_tile_bytes(tb, d, itemsize):
    # A (tb, D) block occupies sublane/lane-padded space in VMEM.
    return _round_up(tb, _SUBLANE) * _round_up(d, _LANE) * itemsize


def _choose_tiling(batch, d, itemsize, batch_tile=None):
    """Returns (tb, padded_batch). tb is a multiple of 128 (or == padded_batch)."""
    if batch_tile is not None:
        tb = int(batch_tile)
        b_pad = _round_up(batch, tb)
        assert tb % _LANE == 0 or tb == b_pad, (
            "batch_tile must be a multiple of 128 (or cover the whole padded batch)")
        return tb, b_pad

    if batch < 2 * _LANE:
        # Tiny batch: a single sublane-padded tile; nothing to pipeline/parallelize.
        b_pad = _round_up(batch, _SUBLANE)
        return b_pad, b_pad

    budget = 4 * 1024 * 1024  # ~4 MiB per padded x tile (2-8 MiB sweet spot, v5e/v7x safe)
    candidates = (65536, 32768, 16384, 8192, 4096, 2048, 1024, 512, 256, 128)

    # Prefer a tile that divides the batch exactly (no padding copy) and leaves
    # at least 2 grid steps (keeps both v7x TensorCores fed).
    for tb in candidates:
        if batch % tb == 0 and tb <= batch // 2 and _padded_x_tile_bytes(tb, d, itemsize) <= budget:
            return tb, batch
    # Otherwise pick purely by budget and zero-pad the batch.
    for tb in candidates:
        if tb <= batch // 2 and _padded_x_tile_bytes(tb, d, itemsize) <= budget:
            return tb, _round_up(batch, tb)
    # Very wide D: fall back to the smallest lane-aligned tile.
    return _LANE, _round_up(batch, _LANE)


def _vmem_limit_bytes(tb, d, h, itemsize):
    x_tile = _padded_x_tile_bytes(tb, d, itemsize)               # double-buffered input
    out_tile = _SUBLANE * _round_up(tb, _LANE) * 4               # (1, tb) block, padded sublanes
    hT = _round_up(h, _SUBLANE) * _round_up(tb, _LANE) * 4       # f32 intermediate
    weights = (_round_up(h, _SUBLANE) * _round_up(d, _LANE) * itemsize
               + 3 * _SUBLANE * _LANE * 4)
    est = 2 * x_tile + 2 * out_tile + hT + weights
    # Generous headroom, floored at 32 MiB, capped below v7x's 64 MiB physical VMEM.
    return int(min(56 * 1024 * 1024, max(32 * 1024 * 1024, 2 * est)))


def two_layer_regression(x, w1, b1, w2, b2, *, batch_tile=None, compute_dtype=None):
    """x: (B, D); w1: (16, D); b1: (16,); w2: (1, 16); b2: (1,).

    Returns relu(x @ w1.T + b1) @ w2.T + b2 with shape (B, 1), matching PyTorch.
    compute_dtype=jnp.bfloat16 streams x/W1 as bf16 (f32 accumulation) for v6e/v7x.
    """
    B, D = x.shape
    H = w1.shape[0]  # hidden width (16)

    in_dtype = jnp.dtype(compute_dtype) if compute_dtype is not None else x.dtype
    xk = x.astype(in_dtype) if x.dtype != in_dtype else x
    w1k = w1.astype(in_dtype) if w1.dtype != in_dtype else w1

    tb, b_pad = _choose_tiling(B, D, jnp.dtype(in_dtype).itemsize, batch_tile)
    if b_pad != B:
        xk = jnp.pad(xk, ((0, b_pad - B), (0, 0)))
    num_tiles = b_pad // tb

    b1_c = b1.reshape(H, 1).astype(jnp.float32)   # (16,1) column, broadcasts over lanes
    w2_c = w2.reshape(H, 1).astype(jnp.float32)   # (16,1) layer-2 weight column
    b2_s = b2.reshape(1, 1).astype(jnp.float32)   # scalar bias -> SMEM

    flops = 2 * B * D * H + 2 * B * H
    bytes_accessed = (b_pad * D * jnp.dtype(in_dtype).itemsize   # x stream
                      + H * D * jnp.dtype(in_dtype).itemsize     # W1
                      + 4 * (2 * H + 1)                          # b1, w2, b2
                      + b_pad * jnp.dtype(x.dtype).itemsize)     # output

    out = pl.pallas_call(
        _two_layer_kernel,
        out_shape=jax.ShapeDtypeStruct((1, b_pad), x.dtype),
        grid=(num_tiles,),
        in_specs=[
            pl.BlockSpec((tb, D), lambda i: (i, 0)),             # x: tiled batch
            pl.BlockSpec((H, D), lambda i: (0, 0)),              # W1, natural (16, D) layout
            pl.BlockSpec((H, 1), lambda i: (0, 0)),              # b1 column
            pl.BlockSpec((H, 1), lambda i: (0, 0)),              # W2 column
            pl.BlockSpec(memory_space=pltpu.MemorySpace.SMEM),   # b2 scalar in SMEM
        ],
        out_specs=pl.BlockSpec((1, tb), lambda i: (0, i)),       # lane-dense output row
        compiler_params=pltpu.CompilerParams(
            dimension_semantics=("parallel",),
            vmem_limit_bytes=_vmem_limit_bytes(tb, D, H, jnp.dtype(in_dtype).itemsize),
        ),
        cost_estimate=pl.CostEstimate(
            flops=int(flops), transcendentals=0, bytes_accessed=int(bytes_accessed)),
    )(xk, w1k, b1_c, w2_c, b2_s)

    # (1, B_pad) -> (B, 1): order-preserving reshape + slice, free outside the kernel.
    return out.reshape(b_pad, 1)[:B]


def _reference(x, w1, b1, w2, b2):
    h = jnp.maximum(x @ w1.T + b1, 0.0)
    return h @ w2.T + b2


def _make_params(key, input_size, hidden=16):
    kw1, kb1, kw2, kb2 = jax.random.split(key, 4)
    bound1 = 1.0 / float(input_size) ** 0.5
    w1 = jax.random.uniform(kw1, (hidden, input_size), jnp.float32, -bound1, bound1)
    b1 = jax.random.uniform(kb1, (hidden,), jnp.float32, -bound1, bound1)
    bound2 = 1.0 / float(hidden) ** 0.5
    w2 = jax.random.uniform(kw2, (1, hidden), jnp.float32, -bound2, bound2)
    b2 = jax.random.uniform(kb2, (1,), jnp.float32, -bound2, bound2)
    return w1, b1, w2, b2


if __name__ == "__main__":
    key = jax.random.PRNGKey(0)
    kparams, kx1, kx2, kx3 = jax.random.split(key, 4)

    input_size, hidden = 32, 16
    w1, b1, w2, b2 = _make_params(kparams, input_size, hidden)

    # Main run: tiled path (batch 512 -> two 256-row lane-dense tiles).
    x = jax.random.normal(kx1, (512, input_size), dtype=jnp.float32)
    out = jax.block_until_ready(two_layer_regression(x, w1, b1, w2, b2))
    ref = _reference(x, w1, b1, w2, b2)
    assert out.shape == (512, 1)
    assert jnp.allclose(out, ref, atol=1e-5, rtol=1e-5)

    # Tiny-batch path (single sublane-padded tile).
    x_small = jax.random.normal(kx2, (8, input_size), dtype=jnp.float32)
    out_small = jax.block_until_ready(two_layer_regression(x_small, w1, b1, w2, b2))
    assert out_small.shape == (8, 1)
    assert jnp.allclose(out_small, _reference(x_small, w1, b1, w2, b2), atol=1e-5, rtol=1e-5)

    # Non-divisible batch -> zero-padded batch path (3 x 256-row tiles for 520 rows).
    x_odd = jax.random.normal(kx3, (520, input_size), dtype=jnp.float32)
    out_odd = jax.block_until_ready(two_layer_regression(x_odd, w1, b1, w2, b2))
    assert out_odd.shape == (520, 1)
    assert jnp.allclose(out_odd, _reference(x_odd, w1, b1, w2, b2), atol=1e-5, rtol=1e-5)

    print("KERNEL_OK")
</pallas_src>

<mosaic_0001>
module attributes {stable_mosaic.version = 11 : i64} {
  func.func @_two_layer_kernel(%arg0: i32, %arg1: memref<256x32xf32, #tpu.memory_space<vmem>>, %arg2: memref<16x32xf32, #tpu.memory_space<vmem>>, %arg3: memref<16x1xf32, #tpu.memory_space<vmem>>, %arg4: memref<16x1xf32, #tpu.memory_space<vmem>>, %arg5: memref<1x1xf32, #tpu.memory_space<smem>>, %arg6: memref<1x256xf32, #tpu.memory_space<vmem>>) attributes {dimension_semantics = [#tpu.dimension_semantics<parallel>], iteration_bounds = array<i64: 2>, scalar_prefetch = 0 : i64, scratch_operands = 0 : i64, tpu.core_type = #tpu.core_type<tc>, window_params = [{transform_indices = @transform_0, window_bounds = array<i64: 256, 32>}, {pipeline_mode = #tpu.pipeline_mode<synchronous>, transform_indices = @transform_1, window_bounds = array<i64: 16, 32>}, {pipeline_mode = #tpu.pipeline_mode<synchronous>, transform_indices = @transform_2, window_bounds = array<i64: 16, 1>}, {pipeline_mode = #tpu.pipeline_mode<synchronous>, transform_indices = @transform_3, window_bounds = array<i64: 16, 1>}, {transform_indices = @transform_4, window_bounds = array<i64: 1, 1>}, {transform_indices = @transform_5, window_bounds = array<i64: 1, 256>}]} {
    %c0 = arith.constant 0 : index
    %c0_0 = arith.constant 0 : index
    %0 = vector.load %arg2[%c0, %c0_0] : memref<16x32xf32, #tpu.memory_space<vmem>>, vector<16x32xf32>
    %c0_1 = arith.constant 0 : index
    %c0_2 = arith.constant 0 : index
    %1 = vector.load %arg1[%c0_1, %c0_2] : memref<256x32xf32, #tpu.memory_space<vmem>>, vector<256x32xf32>
    %cst = arith.constant dense<0.000000e+00> : vector<16x256xf32>
    %2 = tpu.matmul %0, %1, %cst {dimension_numbers = #tpu.dot_dimension_numbers<[1], [1], [0], [0], [0, 0, 1, 0], [], []>} : vector<16x32xf32>, vector<256x32xf32>, vector<16x256xf32> -> vector<16x256xf32>
    %c0_3 = arith.constant 0 : index
    %c0_4 = arith.constant 0 : index
    %3 = vector.load %arg3[%c0_3, %c0_4] : memref<16x1xf32, #tpu.memory_space<vmem>>, vector<16x1xf32>
    %4 = vector.broadcast %3 : vector<16x1xf32> to vector<16x256xf32>
    %5 = arith.addf %2, %4 : vector<16x256xf32>
    %cst_5 = arith.constant 0.000000e+00 : f32
    %6 = vector.broadcast %cst_5 : f32 to vector<16x256xf32>
    %7 = arith.maximumf %5, %6 : vector<16x256xf32>
    %c0_6 = arith.constant 0 : index
    %c0_7 = arith.constant 0 : index
    %8 = vector.load %arg4[%c0_6, %c0_7] : memref<16x1xf32, #tpu.memory_space<vmem>>, vector<16x1xf32>
    %9 = vector.broadcast %8 : vector<16x1xf32> to vector<16x256xf32>
    %10 = arith.mulf %7, %9 : vector<16x256xf32>
    %cst_8 = arith.constant dense<0.000000e+00> : vector<256xf32>
    %11 = vector.multi_reduction <add>, %10, %cst_8 [0] : vector<16x256xf32> to vector<256xf32>
    %12 = vector.shape_cast %11 : vector<256xf32> to vector<1x256xf32>
    %c0_9 = arith.constant 0 : index
    %c0_10 = arith.constant 0 : index
    %13 = memref.load %arg5[%c0_9, %c0_10] : memref<1x1xf32, #tpu.memory_space<smem>>
    %14 = vector.broadcast %13 : f32 to vector<1x256xf32>
    %15 = arith.addf %12, %14 : vector<1x256xf32>
    %c0_11 = arith.constant 0 : index
    %c0_12 = arith.constant 0 : index
    %16 = vector.load %arg6[%c0_11, %c0_12] : memref<1x256xf32, #tpu.memory_space<vmem>>, vector<1x256xf32>
    tpu.vector_store %arg6[%c0_11, %c0_12], %15 {strides = array<i32>} : memref<1x256xf32, #tpu.memory_space<vmem>>, vector<1x256xf32>,
    return
  }
  func.func @transform_0(%arg0: i32) -> (i32, i32) {
    %c0_i32 = arith.constant 0 : i32
    %c0_i32_0 = arith.constant 0 : i32
    return %arg0, %c0_i32 : i32, i32
  }
  func.func @transform_1(%arg0: i32) -> (i32, i32) {
    %c0_i32 = arith.constant 0 : i32
    %c0_i32_0 = arith.constant 0 : i32
    %c0_i32_1 = arith.constant 0 : i32
    return %c0_i32, %c0_i32_0 : i32, i32
  }
  func.func @transform_2(%arg0: i32) -> (i32, i32) {
    %c0_i32 = arith.constant 0 : i32
    %c0_i32_0 = arith.constant 0 : i32
    %c0_i32_1 = arith.constant 0 : i32
    return %c0_i32, %c0_i32_0 : i32, i32
  }
  func.func @transform_3(%arg0: i32) -> (i32, i32) {
    %c0_i32 = arith.constant 0 : i32
    %c0_i32_0 = arith.constant 0 : i32
    %c0_i32_1 = arith.constant 0 : i32
    return %c0_i32, %c0_i32_0 : i32, i32
  }
  func.func @transform_4(%arg0: i32) -> (i32, i32) {
    %c0_i32 = arith.constant 0 : i32
    %c0_i32_0 = arith.constant 0 : i32
    %c0_i32_1 = arith.constant 0 : i32
    return %c0_i32, %c0_i32_0 : i32, i32
  }
  func.func @transform_5(%arg0: i32) -> (i32, i32) {
    %c0_i32 = arith.constant 0 : i32
    %c0_i32_0 = arith.constant 0 : i32
    return %c0_i32, %arg0 : i32, i32
  }
}

</mosaic_0001>

<bundles_post_ra>
// kernel: tpu_custom_call.1
= control target key start
LH: loop header
LB: loop body
LE: loop exit
PB: predicated region body
PF: predicated region fallthrough
CT: control target
= control target key end

     0   :  { %s1058_s0 = inlined_call_operand.vmem [shape: f32[512,32], index: 0, kind: input, shape index: {}]   ;;  %s1059_s1 = inlined_call_operand.vmem [shape: f32[16,32], index: 1, kind: input, shape index: {}]   ;;  %s1060_s2 = inlined_call_operand.vmem [shape: f32[16,1], index: 2, kind: input, shape index: {}]   ;;  %s1061_s3 = inlined_call_operand.vmem [shape: f32[16,1], index: 3, kind: input, shape index: {}]   ;;  %s1062_s4 = inlined_call_operand.<no memory space> [shape: f32[1,1], index: 4, kind: input, shape index: {}]   ;;  %s1063_s5 = inlined_call_operand.hbm [shape: f32[1,512], index: 5, kind: output, shape index: {}]  }
   0x1   :  { %10 = sst [smem:[#allocation2]] %s1062_s4 }
   0x2   :  { %11 = vsyncpa [#allocation4], 0 }
   0x3   :  { %13 = vsyncpa [#allocation4 + $0x1], 0  ;;  %s844_s20 = smov 0   ;;  %s846_s21 = smov 0  }
   0x4   :  { %s848_s22 = smov 0   ;;  %s850_s23 = smov 0  }
   0x5 LB: > { %s587_s4 = sadd.s32 4294967295, %s806_s23   ;;  %s588_s24 = sadd.s32 4294967294, %s806_s23   ;;  %s806_s23 = sphi %s850_s23, %s1069_s23   ;;  %s802_s22 = sphi %s848_s22, %s1068_s22   ;;  %s798_s21 = sphi %s846_s21, %s1067_s21   ;;  %s794_s20 = sphi %s844_s20, %s1066_s20  }
   0x6   : > { %s867_s25 = sadd.s32 1, %s806_s23   ;;  %s136_s26 = sadd.s32 1, %s802_s22 }
   0x7   : > { %s133_s27 = ssub.s32 %s806_s23, %s867_s25  ;;  %p146_p0 = scmp.ne.s32.totalorder %s802_s22, %s798_s21 }
   0x8   : > { %p134_p1 = scmp.eq.s32.totalorder %s133_s27, 0  ;;  %p147_p2 = scmp.eq.s32.totalorder %s587_s4, 1 }
   0x9   : > { %p152_p3 = scmp.ne.s32.totalorder %s798_s21, %s794_s20  ;;  %p153_p4 = scmp.eq.s32.totalorder %s588_s24, 1 }
   0xa   : > { %s877_s28 = scalar_select %p134_p1, %s802_s22, %s136_s26  }
   0xb   : > { %p879_p5 = por %p147_p2, %p146_p0  ;;  %p883_p6 = por %p153_p4, %p152_p3 }
   0xc   : > { %p591_p7 = scmp.ge.s32.totalorder %s806_s23, 1  ;;  %p192_p8 = scmp.lt.s32.totalorder %s806_s23, 3 }
   0xe   : > { %p193_p9 = pnand %p591_p7, %p192_p8 }
   0xf   : > { %s889_s6 = sshll.u32 (!%p193_p9), %s587_s4, 5  ;;  %s487_s7 = sld [smem:[#allocation2]] (!%p193_p9) }
  0x10   : > { %196 = sbr.rel (%p193_p9) target bundleno = 326 (0x146), region = 40  ;;  %p221_p10 = scmp.lt.s32.totalorder (!%p193_p9), %s889_s6, 63 }
  0x11   : > { %s217_s8 = sand.u32 (!%p193_p9), 1, %s798_s21   ;;  %s527_s14 = scalar_lea.hbm (!%p193_p9), %s1063_s5, %s889_s6 }
  0x12   : > { %s592_s9 = sshll.u32 (!%p193_p9), %s217_s8, 1  ;;  %s810_s17 = smov (!%p193_p9), [#allocation3]  }
  0x13   : > { %s219_s10 = scalar_lea.vmem (!%p193_p9), [#allocation3], %s592_s9  ;;  %s750_s18 = sshll.u32 (!%p193_p9), %s810_s17, 4  ;;  %s751_s18 = int_to_ptr.vmem [resolvable:$false] %s750_s18 }
  0x14   : > { %s529_s11 = sshll.u32 (!%p193_p9), %s219_s10, 4  ;;  %s752_s19 = scalar_lea.vmem (!%p193_p9), %s751_s18, 64  ;;  %s530_s11 = int_to_ptr.vmem [resolvable:$true] %s529_s11 }
  0x15   : > { %vm273_vm0 = vcmask 261120   ;;  %v894_v0 = vld [vmem:[%s1059_s1] sm:$0xff]  ;;  %v899_v1 = vld [vmem:[%s1059_s1 + $0x8] sm:$0xff]  ;;  %v808_v4 = vmov 0   ;;  %s222_s15 = scalar_select %p221_p10, %s889_s6, 63 }
  0x16   : > { %v261_v2 = vld [vmem:[%s1060_s2] sm:$0xff]  ;;  %667 = vmatprep.mubr.msk.f32.mxu0 %vm273_vm0, %v894_v0  ;;  %669 = vmatprep.mubr.msk.f32.mxu1 %vm273_vm0, %v899_v1  ;;  %v262_v5 = vld [vmem:[%s1060_s2 + $0x8] sm:$0xff]  ;;  %s746_s16 = scalar_lea.vmem %s530_s11, 32  ;;  %p753_p0 = scmp.lt.s32.totalorder %s530_s11, %s751_s18 }
  0x17   : > { %v457_v3 = vld [vmem:[%s1061_s3] sm:$0xff]  ;;  %744 = vset.pattern.permute.xlu0 %v808_v4  ;;  %745 = vset.pattern.permute.xlu1 %v808_v4  ;;  %v458_v6 = vld [vmem:[%s1061_s3 + $0x8] sm:$0xff]  ;;  %s594_s4 = sshll.u32 %s222_s15, 3  ;;  %v809_v4 = vmov 1966171168   ;;  %s515_s15 = scalar_lea.sflag [#allocation4], %s217_s8 }
  0x18   : > { %265 = vperm.xlu0 %744, %v261_v2   ;;  %461 = vperm.xlu1 %745, %v457_v3   ;;  %s922_s27 = scalar_lea.vmem %s1058_s0, %s594_s4  ;;  %p747_p11 = scmp.ne.s32.totalorder %s530_s11, %s746_s16 }
  0x19   : > { %v260_v7 = vld [vmem:[%s922_s27 + $0xf8] sm:$0xff]  ;;  %v259_v9 = vld [vmem:[%s922_s27 + $0xf0] sm:$0xff]  ;;  %v258_v11 = vld [vmem:[%s922_s27 + $0xe8] sm:$0xff]  ;;  %p754_p1 = scmp.lt.s32.totalorder %s752_s19, %s746_s16 }
  0x1a   : > { %v244_v8 = vld [vmem:[%s922_s27 + $0x78] sm:$0xff]  ;;  %635 = vmatprep.subr.msk.mxu0 %vm273_vm0, %v260_v7  ;;  %671 = vmatprep.subr.msk.mxu1 %vm273_vm0, %v260_v7  ;;  %v243_v10 = vld [vmem:[%s922_s27 + $0x70] sm:$0xff]  ;;  %v242_v12 = vld [vmem:[%s922_s27 + $0x68] sm:$0xff]  ;;  %p748_p12 = pnand %p747_p11, %p879_p5 }
  0x1b   : > { %636 = vmatpush3.xpose.msk.msra.mxu0 %vm273_vm0, %v244_v8  ;;  %687 = vmatpush3.xpose.msk.msra.mxu1 %vm273_vm0, %v244_v8  ;;  %v257_v13 = vld [vmem:[%s922_s27 + $0xe0] sm:$0xff]  ;;  %v256_v15 = vld [vmem:[%s922_s27 + $0xd8] sm:$0xff]  ;;  %v255_v17 = vld [vmem:[%s922_s27 + $0xd0] sm:$0xff]  ;;  %p755_p2 = por %p754_p1, %p753_p0 }
  0x1c   : > { %270 = vperm.xlu0 %744, %v262_v5   ;;  %466 = vperm.xlu1 %745, %v458_v6   ;;  %v241_v14 = vld [vmem:[%s922_s27 + $0x60] sm:$0xff]  ;;  %v240_v16 = vld [vmem:[%s922_s27 + $0x58] sm:$0xff]  ;;  %v239_v18 = vld [vmem:[%s922_s27 + $0x50] sm:$0xff]  ;;  %v495_v5 = vunpack.c.l.s4 %v809_v4  ;;  %v497_v6 = vlaneseq  ;;  %p749_p13 = pneg %p748_p12 }
  0x1d   : > { %637 = vmatprep.subr.msk.mxu0 %vm273_vm0, %v259_v9  ;;  %672 = vmatprep.subr.msk.mxu1 %vm273_vm0, %v259_v9  ;;  %v254_v19 = vld [vmem:[%s922_s27 + $0xc8] sm:$0xff]  ;;  %v253_v21 = vld [vmem:[%s922_s27 + $0xc0] sm:$0xff]  ;;  %v252_v23 = vld [vmem:[%s922_s27 + $0xb8] sm:$0xff] }
  0x1e   : > { %v238_v20 = vld [vmem:[%s922_s27 + $0x48] sm:$0xff]  ;;  %v237_v22 = vld [vmem:[%s922_s27 + $0x40] sm:$0xff]  ;;  %v236_v24 = vld [vmem:[%s922_s27 + $0x38] sm:$0xff]  ;;  %vm511_vm1 = vcmp.lt.s32.totalorder %v497_v6, 256  ;;  %p756_p3 = pnand %p755_p2, %p749_p13 }
  0x1f   : > { %638 = vmatpush3.xpose.msk.msra.mxu0 %vm273_vm0, %v243_v10  ;;  %688 = vmatpush3.xpose.msk.msra.mxu1 %vm273_vm0, %v243_v10  ;;  %v251_v25 = vld [vmem:[%s922_s27 + $0xb0] sm:$0xff]  ;;  %v250_v27 = vld [vmem:[%s922_s27 + $0xa8] sm:$0xff]  ;;  %v249_v29 = vld [vmem:[%s922_s27 + $0xa0] sm:$0xff] }
  0x20   : > { %639 = vmatprep.subr.msk.mxu0 %vm273_vm0, %v258_v11  ;;  %673 = vmatprep.subr.msk.mxu1 %vm273_vm0, %v258_v11  ;;  %v235_v26 = vld [vmem:[%s922_s27 + $0x30] sm:$0xff]  ;;  %v234_v28 = vld [vmem:[%s922_s27 + $0x28] sm:$0xff]  ;;  %v233_v30 = vld [vmem:[%s922_s27 + $0x20] sm:$0xff]  ;;  %v496_v11 = vunpack.c.0.s8 %v495_v5 }
  0x21   : > { %v248_v31 = vld [vmem:[%s922_s27 + $0x98] sm:$0xff]  ;;  %v247_v33 = vld [vmem:[%s922_s27 + $0x90] sm:$0xff]  ;;  %v246_v35 = vld [vmem:[%s922_s27 + $0x88] sm:$0xff] }
  0x22   : > { %v232_v32 = vld [vmem:[%s922_s27 + $0x18] sm:$0xff]  ;;  %v231_v34 = vld [vmem:[%s922_s27 + $0x10] sm:$0xff]  ;;  %v230_v36 = vld [vmem:[%s922_s27 + $0x8] sm:$0xff] }
  0x23   : > { %640 = vmatpush3.xpose.msk.msra.mxu0 %vm273_vm0, %v242_v12  ;;  %689 = vmatpush3.xpose.msk.msra.mxu1 %vm273_vm0, %v242_v12  ;;  %v245_v37 = vld [vmem:[%s922_s27 + $0x80] sm:$0xff]  ;;  %v498_v12 = vshrl.u32 %v497_v6, 7 }
  0x24   : > { %641 = vmatprep.subr.msk.mxu0 %vm273_vm0, %v257_v13  ;;  %674 = vmatprep.subr.msk.mxu1 %vm273_vm0, %v257_v13  ;;  %v229_v38 = vld [vmem:[%s922_s27] sm:$0xff]  ;;  %v488_v13 = vstv %s487_s7 }
  0x27   : > { %642 = vmatpush3.xpose.msk.msra.mxu0 %vm273_vm0, %v241_v14  ;;  %690 = vmatpush3.xpose.msk.msra.mxu1 %vm273_vm0, %v241_v14 }
  0x28   : > { %643 = vmatprep.subr.msk.mxu0 %vm273_vm0, %v256_v15  ;;  %675 = vmatprep.subr.msk.mxu1 %vm273_vm0, %v256_v15 }
  0x2b   : > { %644 = vmatpush3.xpose.msk.msra.mxu0 %vm273_vm0, %v240_v16  ;;  %691 = vmatpush3.xpose.msk.msra.mxu1 %vm273_vm0, %v240_v16 }
  0x2c   : > { %645 = vmatprep.subr.msk.mxu0 %vm273_vm0, %v255_v17  ;;  %676 = vmatprep.subr.msk.mxu1 %vm273_vm0, %v255_v17  ;;  %v499_v17 = vsub.s32 %v496_v11, %v498_v12 }
  0x2f   : > { %646 = vmatpush3.xpose.msk.msra.mxu0 %vm273_vm0, %v239_v18  ;;  %692 = vmatpush3.xpose.msk.msra.mxu1 %vm273_vm0, %v239_v18 }
  0x30   : > { %647 = vmatprep.subr.msk.mxu0 %vm273_vm0, %v254_v19  ;;  %677 = vmatprep.subr.msk.mxu1 %vm273_vm0, %v254_v19 }
  0x33   : > { %648 = vmatpush3.xpose.msk.msra.mxu0 %vm273_vm0, %v238_v20  ;;  %693 = vmatpush3.xpose.msk.msra.mxu1 %vm273_vm0, %v238_v20 }
  0x34   : > { %649 = vmatprep.subr.msk.mxu0 %vm273_vm0, %v253_v21  ;;  %678 = vmatprep.subr.msk.mxu1 %vm273_vm0, %v253_v21 }
  0x37   : > { %650 = vmatpush3.xpose.msk.msra.mxu0 %vm273_vm0, %v237_v22  ;;  %694 = vmatpush3.xpose.msk.msra.mxu1 %vm273_vm0, %v237_v22 }
  0x38   : > { %651 = vmatprep.subr.msk.mxu0 %vm273_vm0, %v252_v23  ;;  %679 = vmatprep.subr.msk.mxu1 %vm273_vm0, %v252_v23 }
  0x3b   : > { %652 = vmatpush3.xpose.msk.msra.mxu0 %vm273_vm0, %v236_v24  ;;  %695 = vmatpush3.xpose.msk.msra.mxu1 %vm273_vm0, %v236_v24 }
  0x3c   : > { %653 = vmatprep.subr.msk.mxu0 %vm273_vm0, %v251_v25  ;;  %680 = vmatprep.subr.msk.mxu1 %vm273_vm0, %v251_v25 }
  0x3f   : > { %654 = vmatpush3.xpose.msk.msra.mxu0 %vm273_vm0, %v235_v26  ;;  %696 = vmatpush3.xpose.msk.msra.mxu1 %vm273_vm0, %v235_v26 }
  0x40   : > { %655 = vmatprep.subr.msk.mxu0 %vm273_vm0, %v250_v27  ;;  %681 = vmatprep.subr.msk.mxu1 %vm273_vm0, %v250_v27 }
  0x43   : > { %656 = vmatpush3.xpose.msk.msra.mxu0 %vm273_vm0, %v234_v28  ;;  %697 = vmatpush3.xpose.msk.msra.mxu1 %vm273_vm0, %v234_v28 }
  0x44   : > { %657 = vmatprep.subr.msk.mxu0 %vm273_vm0, %v249_v29  ;;  %682 = vmatprep.subr.msk.mxu1 %vm273_vm0, %v249_v29 }
  0x47   : > { %658 = vmatpush3.xpose.msk.msra.mxu0 %vm273_vm0, %v233_v30  ;;  %698 = vmatpush3.xpose.msk.msra.mxu1 %vm273_vm0, %v233_v30 }
  0x48   : > { %659 = vmatprep.subr.msk.mxu0 %vm273_vm0, %v248_v31  ;;  %683 = vmatprep.subr.msk.mxu1 %vm273_vm0, %v248_v31 }
  0x4b   : > { %660 = vmatpush3.xpose.msk.msra.mxu0 %vm273_vm0, %v232_v32  ;;  %699 = vmatpush3.xpose.msk.msra.mxu1 %vm273_vm0, %v232_v32 }
  0x4c   : > { %661 = vmatprep.subr.msk.mxu0 %vm273_vm0, %v247_v33  ;;  %684 = vmatprep.subr.msk.mxu1 %vm273_vm0, %v247_v33 }
  0x4f   : > { %662 = vmatpush3.xpose.msk.msra.mxu0 %vm273_vm0, %v231_v34  ;;  %700 = vmatpush3.xpose.msk.msra.mxu1 %vm273_vm0, %v231_v34 }
  0x50   : > { %663 = vmatprep.subr.msk.mxu0 %vm273_vm0, %v246_v35  ;;  %685 = vmatprep.subr.msk.mxu1 %vm273_vm0, %v246_v35 }
  0x53   : > { %664 = vmatpush3.xpose.msk.msra.mxu0 %vm273_vm0, %v230_v36  ;;  %701 = vmatpush3.xpose.msk.msra.mxu1 %vm273_vm0, %v230_v36 }
  0x54   : > { %665 = vmatprep.subr.msk.mxu0 %vm273_vm0, %v245_v37  ;;  %686 = vmatprep.subr.msk.mxu1 %vm273_vm0, %v245_v37 }
  0x57   : > { %666 = vmatpush3.xpose.msk.msra.mxu0 %vm273_vm0, %v229_v38  ;;  %702 = vmatpush3.xpose.msk.msra.mxu1 %vm273_vm0, %v229_v38 }
  0x5a   : > { %668 = vmatmul.mubr.msk.f32.vlgmr.msra.gmra.mxu0 %vm273_vm0, %v894_v0  ;;  %670 = vmatmul.mubr.msk.f32.vlgmr.msra.gmra.mxu1 %vm273_vm0, %v899_v1 }
  0x93   : > { %v266_v39 = vpop.permute.xlu0 %265  ;;  %v462_v40 = vpop.permute.xlu1 %461 }
  0x97   : > { %v271_v41 = vpop.permute.xlu0 %270  ;;  %v467_v52 = vpop.permute.xlu1 %466 }
 0x11a   : > { %v442_v42 = vpop.f32.mrf.mxu0  ;;  %v448_v43 = vpop.f32.mrf.mxu1 }
 0x11b   : > { %v443_v44 = vadd.f32 %v442_v42, %v266_v39  ;;  %v449_v45 = vadd.f32 %v448_v43, %v271_v41 }
 0x11c   : > { %v444_v46 = vpop.f32.mrf.mxu0  ;;  %v450_v47 = vpop.f32.mrf.mxu1 }
 0x11d   : > { %v453_v48 = vmax.f32 %v443_v44, 0.0  ;;  %v455_v49 = vmax.f32 %v449_v45, 0.0  ;;  %v445_v50 = vadd.f32 %v444_v46, %v266_v39  ;;  %v451_v51 = vadd.f32 %v450_v47, %v271_v41 }
 0x11f   : > { %v469_v53 = vmul.f32 %v462_v40, %v453_v48  ;;  %v471_v54 = vmul.f32 %v467_v52, %v455_v49  ;;  %v454_v55 = vmax.f32 %v445_v50, 0.0  ;;  %v456_v56 = vmax.f32 %v451_v51, 0.0 }
 0x121   : > { %v473_v57 = vadd.f32 %v471_v54, %v469_v53  ;;  %v470_v58 = vmul.f32 %v462_v40, %v454_v55  ;;  %v472_v59 = vmul.f32 %v467_v52, %v456_v56 }
 0x123   : > { %v474_v60 = vrot.slane %v473_v57, 4  ;;  %v480_v61 = vadd.f32 %v472_v59, %v470_v58 }
 0x125   : > { %v475_v62 = vadd.f32 %v474_v60, %v473_v57  ;;  %v481_v63 = vrot.slane %v480_v61, 4 }
 0x127   : > { %v476_v0 = vrot.slane %v475_v62, 2  ;;  %v482_v1 = vadd.f32 %v481_v63, %v480_v61 }
 0x129   : > { %v477_v2 = vadd.f32 %v476_v0, %v475_v62  ;;  %v483_v3 = vrot.slane %v482_v1, 2 }
 0x12b   : > { %v478_v7 = vrot.slane %v477_v2, 1  ;;  %v484_v8 = vadd.f32 %v483_v3, %v482_v1 }
 0x12d   : > { %v479_v9 = vadd.f32 %v478_v7, %v477_v2  ;;  %v485_v10 = vrot.slane %v484_v8, 1 }
 0x12f   : > { %v486_v14 = vadd.f32 %v485_v10, %v484_v8  ;;  %v489_v15 = vadd.f32 %v488_v13, %v479_v9 }
 0x131   : > { %v490_v16 = vadd.f32 %v488_v13, %v486_v14 }
 0x133   : > { %v493_v18 = vcombine.low %v489_v15, %v490_v16 }
 0x135   : > { %v500_v19 = vrot.slane %v493_v18, %v499_v17 }
 0x137   : > { %v507_v20 = vrot.slane %v500_v19, %v499_v17 }
 0x139   : > { %513 = vst.msk [vmem:[%s219_s10] sm:$0x3] %vm511_vm1, %v507_v20 }
 0x13a   : > { %759 = shalt.err (!%p756_p3)
}
 0x13b   : > { %s760_s4 = scalar_lea.hbm %s527_s14, 32  ;;  %s764_s26 = scalar_lea.hbm %s1063_s5, 64 }
 0x13c   : > { %p761_p4 = scmp.ne.s32.totalorder %s527_s14, %s760_s4  ;;  %p765_p9 = scmp.lt.s32.totalorder %s527_s14, %s1063_s5 }
 0x13d   : > { %p766_p10 = scmp.lt.s32.totalorder %s764_s26, %s760_s4 }
 0x13e   : > { %p762_p7 = pnand %p761_p4, %p879_p5 }
 0x13f   : > { %p767_p11 = por %p766_p10, %p765_p9 }
 0x140   : > { %p763_p8 = pneg %p762_p7 }
 0x142   : > { %p768_p12 = pnand %p767_p11, %p763_p8 }
 0x144   : > { %771 = shalt.err (!%p768_p12)
}
 0x145   : > { %703 = dma.vmem_to_hbm [thread:$0]  (%p879_p5), %s530_s11, 32, %s527_s14, %s515_s15  }
 0x146 PF: > { %p709_p13 = scmp.ge.s32.totalorder %s806_s23, 2  ;;  %s541_s8 = sand.u32 1, %s794_s20  }
 0x147   : > { %s542_s9 = scalar_lea.sflag [#allocation4], %s541_s8 }
 0x148   : > { %p706_p0 = pnand %p709_p13, %p883_p6 }
 0x14a   : > { %p707_p1 = pneg %p706_p0 }
 0x14c   : > { %789 = dma.done.wait (%p707_p1), %s542_s9, 32  }
 0x14d   : > { %791 = vsyncadd (%p707_p1), %s542_s9, 4294967264  ;;  %p16_p2 = scmp.ge.s32.totalorder %s867_s25, 4   ;;  %s1066_s20 = smov %s798_s21 }
 0x14e   : > { %s1067_s21 = smov %s802_s22  ;;  %s1068_s22 = smov %s877_s28 }
 0x14f   : > { %s1069_s23 = smov %s867_s25  ;;  %18 = sbr.rel (!%p16_p2) target bundleno = 5 (0x5), region = 75 }
 0x154   :  { %547 = vsyncpa [#allocation4], 1 }
 0x155   :  { %549 = vsyncpa [#allocation4 + $0x1], 1 }

</bundles_post_ra>
